<compile_context>
chip_gen: v5e
topology: v5e:2x2
jax: 0.10.0
libtpu: 0.0.40
codegen_flags: <defaults>
</compile_context>

<pallas_src>
import functools

import jax
import jax.numpy as jnp
import numpy as np
from jax.experimental import pallas as pl
from jax.experimental.pallas import tpu as pltpu


def _round_up(x, m):
    return (x + m - 1) // m * m


def _double_attn_kernel(x_ref, w_ref, bA_ref, bV_ref, z_ref,
                        m_scr, l_scr, gt_scr, gf_scr, *,
                        c_m, c_n, c_m_pad, c_n_pad,
                        kl_total, kl_tile, compute_dtype):
    # x_ref : (1, C, kl_tile)   f32 slab tile, channels-first
    # w_ref : (c_m_pad + 2*c_n_pad, C)  fused convA|convB|convV weights
    # bA_ref: (c_m_pad, 1) f32  convA bias (folded into G)
    # bV_ref: (c_n_pad, 1) f32  convV bias
    # z_ref : (1, c_m, kl_tile)
    # m/l   : (c_n_pad, 1) f32  running max / denom for softmaxB over KL
    # gt_scr: (c_n_pad, c_m_pad) f32   un-normalized G^T accumulator
    # gf_scr: (c_m_pad, c_n_pad) cd    finalized G
    p = pl.program_id(1)
    t = pl.program_id(2)
    c_ab = c_m_pad + c_n_pad
    ragged = (kl_total % kl_tile) != 0
    is_f32 = jnp.dtype(compute_dtype) == jnp.dtype(jnp.float32)

    @pl.when((p == 0) & (t == 0))
    def _init():
        m_scr[...] = jnp.full_like(m_scr, -jnp.inf)
        l_scr[...] = jnp.zeros_like(l_scr)
        gt_scr[...] = jnp.zeros_like(gt_scr)

    @pl.when(p == 0)
    def _accumulate():
        # In-kernel cast (no wrapper-side HBM cast pass); no-op on the f32 path.
        X = x_ref[0].astype(compute_dtype)                       # (C, T)
        # Fused A|B projection: one wide MXU push, f32 accumulation.
        P = jnp.dot(w_ref[:c_ab, :], X,
                    preferred_element_type=jnp.float32)          # (c_ab, T)
        A = P[:c_m_pad, :]                                       # aligned slice
        Blog = P[c_m_pad:, :]                                    # convB bias cancels
        if ragged:
            # Mask the OOB lanes of the (only) partial tail tile: exclude them
            # from the softmax stats and zero A so garbage can't reach G.
            rem = kl_total - t * kl_tile
            lane = jax.lax.broadcasted_iota(jnp.int32, (1, kl_tile), 1)
            valid = lane < rem
            A = jnp.where(valid, A, 0.0)
            Blog = jnp.where(valid, Blog, -jnp.inf)

        # Online softmax over KL (B path), flash-style rescaling.
        m_prev = m_scr[...]
        m_new = jnp.maximum(m_prev, jnp.max(Blog, axis=1, keepdims=True))
        alpha = jnp.exp(m_prev - m_new)                          # (c_n_pad, 1)
        # exp in the compute dtype (bf16 EUP on v6e/v7x); exact on the f32 path.
        Bexp = jnp.exp((Blog - m_new).astype(compute_dtype))     # (c_n_pad, T)
        l_scr[...] = alpha * l_scr[...] + jnp.sum(
            Bexp, axis=1, keepdims=True, dtype=jnp.float32)
        # G^T accumulation: contract over the KL lanes of BOTH operands
        # (canonical attention Q@K^T shape — no materialized slab transpose).
        gt_scr[...] = gt_scr[...] * alpha + jax.lax.dot_general(
            Bexp, A.astype(compute_dtype),
            dimension_numbers=(((1,), (1,)), ((), ())),
            preferred_element_type=jnp.float32)
        m_scr[...] = m_new

    @pl.when((p == 1) & (t == 0))
    def _finalize_g():
        # Fold the softmaxB normalization (columns of sB sum to 1 -> exact
        # divide by the tiny (c_n,1) denominator) and the convA bias into G.
        g = jnp.transpose(gt_scr[...] * (1.0 / l_scr[...]))      # (c_m_pad, c_n_pad)
        gf_scr[...] = (g + bA_ref[...]).astype(compute_dtype)

    @pl.when(p == 1)
    def _emit():
        X = x_ref[0].astype(compute_dtype)
        Vlog = jnp.dot(w_ref[c_ab:, :], X,
                       preferred_element_type=jnp.float32) + bV_ref[...]
        if c_n_pad != c_n:
            # Padded attention-vector rows must not leak into softmaxV.
            row = jax.lax.broadcasted_iota(jnp.int32, (c_n_pad, 1), 0)
            Vlog = jnp.where(row < c_n, Vlog, -jnp.inf)
        # softmaxV over the c_n (sublane) axis — purely local to the tile.
        Vexp = jnp.exp((Vlog - jnp.max(Vlog, axis=0, keepdims=True))
                       .astype(compute_dtype))                   # (c_n_pad, T)
        denom = jnp.sum(Vexp, axis=0, keepdims=True, dtype=jnp.float32)
        inv = pl.reciprocal(denom, approx=True)
        if is_f32:
            # Newton refinement only where strict f32 parity matters.
            inv = inv * (2.0 - denom * inv)
            inv = inv * (2.0 - denom * inv)
        sV = Vexp * inv.astype(compute_dtype)                    # (c_n_pad, T)

        Z = jnp.dot(gf_scr[...], sV,
                    preferred_element_type=jnp.float32)          # (c_m_pad, T)
        if c_m_pad != c_m:
            Z = Z[:c_m, :]
        z_ref[0] = Z.astype(z_ref.dtype)
        # OOB lanes of the ragged tail tile are dropped by Pallas on writeback.


@functools.partial(jax.jit,
                   static_argnames=("c_m", "c_n", "K", "compute_dtype",
                                    "kl_tile"))
def double_attention_forward(x, params, c_m, c_n, K=1,
                             compute_dtype=jnp.float32, kl_tile=None):
    """x: (b, C, d, h, w) float32 (NCDHW, like the PyTorch module)."""
    b, C, d, h, w = x.shape
    assert b % K == 0
    L = d * h * w
    batch = b // K
    KL = K * L
    wA, bA, wB, bB, wV, bV = params
    del bB  # constant along the KL softmax axis -> cancels exactly.

    # ---- KL tiling (512-wide target; ragged tail handled in-kernel) ----
    if kl_tile is None:
        kl_tile = KL if KL <= 512 else 512
    kl_tile = min(kl_tile, KL)
    assert kl_tile == KL or kl_tile % 128 == 0, (
        "kl_tile must be a multiple of 128 (or the full KL extent)")
    nkt = pl.cdiv(KL, kl_tile)

    # ---- sublane-aligned projection sections ----
    c_m_pad = _round_up(c_m, 8)
    c_n_pad = _round_up(c_n, 8)
    c_tot_p = c_m_pad + 2 * c_n_pad

    def _pad_rows(wt, rows_to):
        wt = wt.T                                           # (rows, C)
        return jnp.pad(wt, ((0, rows_to - wt.shape[0]), (0, 0)))

    w_cat = jnp.concatenate([_pad_rows(wA, c_m_pad),
                             _pad_rows(wB, c_n_pad),
                             _pad_rows(wV, c_n_pad)],
                            axis=0).astype(compute_dtype)   # (c_tot_p, C)
    bA_col = jnp.pad(bA.reshape(c_m, 1),
                     ((0, c_m_pad - c_m), (0, 0))).astype(jnp.float32)
    bV_col = jnp.pad(bV.reshape(c_n, 1),
                     ((0, c_n_pad - c_n), (0, 0))).astype(jnp.float32)

    # ---- channels-first slab; K == 1 is a pure reshape, no HBM pass ----
    if K == 1:
        x_cf = x.reshape(batch, C, KL)
    else:
        x_cf = (x.reshape(batch, K, C, L)
                 .transpose(0, 2, 1, 3)
                 .reshape(batch, C, KL))
    # NOTE: no .astype / jnp.pad here — X stays f32 in HBM; the kernel casts
    # each (C, kl_tile) block and masks the ragged tail.

    # ---- VMEM budget: per-step blocks + temporaries; cap by the chip ----
    try:
        vmem_cap = int(pltpu.get_tpu_info().vmem_capacity_bytes)
    except Exception:
        vmem_cap = 64 << 20                  # conservative (v7x per-core)
    cd_bytes = jnp.dtype(compute_dtype).itemsize
    est = (2 * C * kl_tile * 4                       # X block, double-buffered
           + 2 * c_m * kl_tile * cd_bytes            # Z block, double-buffered
           + 2 * c_tot_p * C * cd_bytes              # fused weights
           + 12 * (c_m_pad + c_n_pad) * kl_tile * 4  # in-kernel temporaries
           + 4 * c_m_pad * c_n_pad * 4)              # G scratches
    vmem_limit = int(min(max(2 * est, 32 << 20), int(0.85 * vmem_cap)))

    kernel = functools.partial(
        _double_attn_kernel, c_m=c_m, c_n=c_n,
        c_m_pad=c_m_pad, c_n_pad=c_n_pad,
        kl_total=KL, kl_tile=kl_tile, compute_dtype=compute_dtype)

    grid_spec = pltpu.PrefetchScalarGridSpec(
        num_scalar_prefetch=0,
        grid=(batch, 2, nkt),                # (slab, phase, KL tile)
        in_specs=[
            pl.BlockSpec((1, C, kl_tile), lambda bi, p, t: (bi, 0, t)),
            pl.BlockSpec((c_tot_p, C), lambda bi, p, t: (0, 0)),   # resident
            pl.BlockSpec((c_m_pad, 1), lambda bi, p, t: (0, 0)),
            pl.BlockSpec((c_n_pad, 1), lambda bi, p, t: (0, 0)),
        ],
        # Phase 0 never writes the output: keep its block index pinned at tile
        # 0 (t*p) so no garbage writeback happens; phase 1 walks the tiles.
        out_specs=pl.BlockSpec((1, c_m, kl_tile),
                               lambda bi, p, t: (bi, 0, t * p)),
        scratch_shapes=[
            pltpu.VMEM((c_n_pad, 1), jnp.float32),          # running max m
            pltpu.VMEM((c_n_pad, 1), jnp.float32),          # running denom l
            pltpu.VMEM((c_n_pad, c_m_pad), jnp.float32),    # G^T accumulator
            pltpu.VMEM((c_m_pad, c_n_pad), compute_dtype),  # finalized G
        ],
    )

    z = pl.pallas_call(
        kernel,
        out_shape=jax.ShapeDtypeStruct((batch, c_m, KL), compute_dtype),
        grid_spec=grid_spec,
        compiler_params=pltpu.CompilerParams(
            dimension_semantics=("parallel", "arbitrary", "arbitrary"),
            vmem_limit_bytes=vmem_limit),
    )(x_cf, w_cat, bA_col, bV_col)

    if K == 1:
        out = z.reshape(b, c_m, d, h, w)
    else:
        out = (z.reshape(batch, c_m, K, L)
                .transpose(0, 2, 1, 3)
                .reshape(b, c_m, d, h, w))
    return out


def _reference_forward(x, params, c_m, c_n, K=1):
    """Pure-jnp reference mirroring the PyTorch module exactly."""
    wA, bA, wB, bB, wV, bV = params
    b, C, d, h, w = x.shape
    L = d * h * w
    batch = b // K
    xf = x.reshape(b, C, L).transpose(0, 2, 1)                    # (b, L, C)
    A = (xf @ wA + bA).transpose(0, 2, 1).reshape(b, c_m, d, h, w)
    B = (xf @ wB + bB).transpose(0, 2, 1).reshape(b, c_n, d, h, w)
    V = (xf @ wV + bV).transpose(0, 2, 1).reshape(b, c_n, d, h, w)
    tmpA = A.reshape(batch, K, c_m, L).transpose(0, 2, 1, 3).reshape(batch, c_m, K * L)
    tmpB = B.reshape(batch, K, c_n, L).transpose(0, 2, 1, 3).reshape(batch * c_n, K * L)
    tmpV = V.reshape(batch, K, c_n, L).transpose(0, 1, 3, 2).reshape(b * L, c_n)
    softmaxB = jax.nn.softmax(tmpB, axis=1).reshape(batch, c_n, K * L).transpose(0, 2, 1)
    softmaxV = jax.nn.softmax(tmpV, axis=1).reshape(batch, K * L, c_n).transpose(0, 2, 1)
    tmpG = jnp.einsum('bmk,bkn->bmn', tmpA, softmaxB)
    tmpZ = jnp.einsum('bmn,bnk->bmk', tmpG, softmaxV)
    return (tmpZ.reshape(batch, c_m, K, L)
                .transpose(0, 2, 1, 3)
                .reshape(b, c_m, d, h, w))


if __name__ == "__main__":
    # Small shapes; KL = 5*6*7 = 210 so a 128-wide KL tile exercises the
    # online-softmax accumulation, the ragged masked tail and OOB-drop writes.
    b, C, d, h, w = 2, 8, 5, 6, 7
    c_m, c_n, K = 16, 8, 1

    key = jax.random.PRNGKey(0)
    kx, kwa, kba, kwb, kbb, kwv, kbv = jax.random.split(key, 7)

    x = jax.random.normal(kx, (b, C, d, h, w), dtype=jnp.float32)

    # Deterministic parameter init (Conv3d 1x1x1 == linear map over channels).
    scale = 1.0 / np.sqrt(C)
    wA = jax.random.uniform(kwa, (C, c_m), jnp.float32, -scale, scale)
    bA = jax.random.uniform(kba, (1, c_m), jnp.float32, -scale, scale)
    wB = jax.random.uniform(kwb, (C, c_n), jnp.float32, -scale, scale)
    bB = jax.random.uniform(kbb, (1, c_n), jnp.float32, -scale, scale)
    wV = jax.random.uniform(kwv, (C, c_n), jnp.float32, -scale, scale)
    bV = jax.random.uniform(kbv, (1, c_n), jnp.float32, -scale, scale)
    params = (wA, bA, wB, bB, wV, bV)

    ref = jax.block_until_ready(_reference_forward(x, params, c_m, c_n, K))

    # f32, single KL tile per slab (exact PyTorch-module semantics).
    out = jax.block_until_ready(
        double_attention_forward(x, params, c_m=c_m, c_n=c_n, K=K))
    np.testing.assert_allclose(np.asarray(out), np.asarray(ref),
                               rtol=1e-5, atol=1e-5)
    assert out.shape == (b, c_m, d, h, w)

    # f32, forced KL tiling (128-wide tiles + ragged 82-wide tail).
    out_tiled = jax.block_until_ready(
        double_attention_forward(x, params, c_m=c_m, c_n=c_n, K=K,
                                 kl_tile=128))
    np.testing.assert_allclose(np.asarray(out_tiled), np.asarray(ref),
                               rtol=1e-5, atol=1e-5)

    # bf16 production path (bf16 MXU operands, bf16 exp, bf16 output);
    # loose tolerance is the expected bf16 rounding, not a semantics change.
    out_bf16 = jax.block_until_ready(
        double_attention_forward(x, params, c_m=c_m, c_n=c_n, K=K,
                                 compute_dtype=jnp.bfloat16, kl_tile=128))
    np.testing.assert_allclose(np.asarray(out_bf16.astype(jnp.float32)),
                               np.asarray(ref), rtol=1e-1, atol=1e-1)

    print("KERNEL_OK")
</pallas_src>

<mosaic_0001>
module attributes {stable_mosaic.version = 11 : i64} {
  func.func @_double_attn_kernel(%arg0: i32, %arg1: i32, %arg2: i32, %arg3: memref<1x8x210xf32, #tpu.memory_space<vmem>>, %arg4: memref<32x8xf32, #tpu.memory_space<vmem>>, %arg5: memref<16x1xf32, #tpu.memory_space<vmem>>, %arg6: memref<8x1xf32, #tpu.memory_space<vmem>>, %arg7: memref<1x16x210xf32, #tpu.memory_space<vmem>>, %arg8: memref<8x1xf32, #tpu.memory_space<vmem>>, %arg9: memref<8x1xf32, #tpu.memory_space<vmem>>, %arg10: memref<8x16xf32, #tpu.memory_space<vmem>>, %arg11: memref<16x8xf32, #tpu.memory_space<vmem>>) attributes {dimension_semantics = [#tpu.dimension_semantics<parallel>, #tpu.dimension_semantics<arbitrary>, #tpu.dimension_semantics<arbitrary>], iteration_bounds = array<i64: 2, 2, 1>, scalar_prefetch = 0 : i64, scratch_operands = 4 : i64, tpu.core_type = #tpu.core_type<tc>, window_params = [{transform_indices = @transform_0, window_bounds = array<i64: 1, 8, 210>}, {pipeline_mode = #tpu.pipeline_mode<synchronous>, transform_indices = @transform_1, window_bounds = array<i64: 32, 8>}, {pipeline_mode = #tpu.pipeline_mode<synchronous>, transform_indices = @transform_2, window_bounds = array<i64: 16, 1>}, {pipeline_mode = #tpu.pipeline_mode<synchronous>, transform_indices = @transform_3, window_bounds = array<i64: 8, 1>}, {transform_indices = @transform_4, window_bounds = array<i64: 1, 16, 210>}]} {
    %c0_i32 = arith.constant 0 : i32
    %0 = arith.cmpi eq, %arg1, %c0_i32 : i32
    %c0_i32_0 = arith.constant 0 : i32
    %1 = arith.cmpi eq, %arg2, %c0_i32_0 : i32
    %2 = arith.andi %0, %1 : i1
    %3 = arith.extui %2 : i1 to i32
    %c0_i32_1 = arith.constant 0 : i32
    %4 = arith.cmpi ne, %3, %c0_i32_1 : i32
    scf.if %4 {
      %cst = arith.constant 0xFF800000 : f32
      %16 = vector.broadcast %cst : f32 to vector<8x1xf32>
      %c0 = arith.constant 0 : index
      %c0_8 = arith.constant 0 : index
      %17 = vector.load %arg8[%c0, %c0_8] : memref<8x1xf32, #tpu.memory_space<vmem>>, vector<8x1xf32>
      tpu.vector_store %arg8[%c0, %c0_8], %16 {strides = array<i32>} : memref<8x1xf32, #tpu.memory_space<vmem>>, vector<8x1xf32>,
      %cst_9 = arith.constant 0.000000e+00 : f32
      %18 = vector.broadcast %cst_9 : f32 to vector<8x1xf32>
      %c0_10 = arith.constant 0 : index
      %c0_11 = arith.constant 0 : index
      %19 = vector.load %arg9[%c0_10, %c0_11] : memref<8x1xf32, #tpu.memory_space<vmem>>, vector<8x1xf32>
      tpu.vector_store %arg9[%c0_10, %c0_11], %18 {strides = array<i32>} : memref<8x1xf32, #tpu.memory_space<vmem>>, vector<8x1xf32>,
      %cst_12 = arith.constant 0.000000e+00 : f32
      %20 = vector.broadcast %cst_12 : f32 to vector<8x16xf32>
      %c0_13 = arith.constant 0 : index
      %c0_14 = arith.constant 0 : index
      %21 = vector.load %arg10[%c0_13, %c0_14] : memref<8x16xf32, #tpu.memory_space<vmem>>, vector<8x16xf32>
      tpu.vector_store %arg10[%c0_13, %c0_14], %20 {strides = array<i32>} : memref<8x16xf32, #tpu.memory_space<vmem>>, vector<8x16xf32>,
    } else {
    }
    %c0_i32_2 = arith.constant 0 : i32
    %5 = arith.cmpi eq, %arg1, %c0_i32_2 : i32
    %6 = arith.extui %5 : i1 to i32
    %c0_i32_3 = arith.constant 0 : i32
    %7 = arith.cmpi ne, %6, %c0_i32_3 : i32
    scf.if %7 {
      %c0 = arith.constant 0 : index
      %c0_8 = arith.constant 0 : index
      %c0_9 = arith.constant 0 : index
      %16 = vector.load %arg3[%c0, %c0_8, %c0_9] : memref<1x8x210xf32, #tpu.memory_space<vmem>>, vector<1x8x210xf32>
      %17 = vector.shape_cast %16 : vector<1x8x210xf32> to vector<8x210xf32>
      %c0_10 = arith.constant 0 : index
      %c0_11 = arith.constant 0 : index
      %18 = vector.load %arg4[%c0_10, %c0_11] : memref<32x8xf32, #tpu.memory_space<vmem>>, vector<24x8xf32>
      %cst = arith.constant dense<0.000000e+00> : vector<24x210xf32>
      %19 = tpu.matmul %18, %17, %cst {dimension_numbers = #tpu.dot_dimension_numbers<[1], [0], [0], [1], [0, 0, 1, 1], [], []>} : vector<24x8xf32>, vector<8x210xf32>, vector<24x210xf32> -> vector<24x210xf32>
      %20 = vector.extract_strided_slice %19 {offsets = [0, 0], sizes = [16, 210], strides = [1, 1]} : vector<24x210xf32> to vector<16x210xf32>
      %21 = vector.extract_strided_slice %19 {offsets = [16, 0], sizes = [8, 210], strides = [1, 1]} : vector<24x210xf32> to vector<8x210xf32>
      %c0_12 = arith.constant 0 : index
      %c0_13 = arith.constant 0 : index
      %22 = vector.load %arg8[%c0_12, %c0_13] : memref<8x1xf32, #tpu.memory_space<vmem>>, vector<8x1xf32>
      %cst_14 = arith.constant dense<0xFF800000> : vector<8xf32>
      %23 = vector.multi_reduction <maximumf>, %21, %cst_14 [1] : vector<8x210xf32> to vector<8xf32>
      %24 = vector.shape_cast %23 : vector<8xf32> to vector<8x1xf32>
      %25 = arith.maximumf %22, %24 : vector<8x1xf32>
      %26 = arith.subf %22, %25 : vector<8x1xf32>
      %27 = math.exp %26 : vector<8x1xf32>
      %28 = vector.broadcast %25 : vector<8x1xf32> to vector<8x210xf32>
      %29 = arith.subf %21, %28 : vector<8x210xf32>
      %30 = math.exp %29 : vector<8x210xf32>
      %c0_15 = arith.constant 0 : index
      %c0_16 = arith.constant 0 : index
      %31 = vector.load %arg9[%c0_15, %c0_16] : memref<8x1xf32, #tpu.memory_space<vmem>>, vector<8x1xf32>
      %32 = arith.mulf %27, %31 : vector<8x1xf32>
      %cst_17 = arith.constant dense<0.000000e+00> : vector<8xf32>
      %33 = vector.multi_reduction <add>, %30, %cst_17 [1] : vector<8x210xf32> to vector<8xf32>
      %34 = vector.shape_cast %33 : vector<8xf32> to vector<8x1xf32>
      %35 = arith.addf %32, %34 : vector<8x1xf32>
      %c0_18 = arith.constant 0 : index
      %c0_19 = arith.constant 0 : index
      %36 = vector.load %arg9[%c0_18, %c0_19] : memref<8x1xf32, #tpu.memory_space<vmem>>, vector<8x1xf32>
      tpu.vector_store %arg9[%c0_18, %c0_19], %35 {strides = array<i32>} : memref<8x1xf32, #tpu.memory_space<vmem>>, vector<8x1xf32>,
      %c0_20 = arith.constant 0 : index
      %c0_21 = arith.constant 0 : index
      %37 = vector.load %arg10[%c0_20, %c0_21] : memref<8x16xf32, #tpu.memory_space<vmem>>, vector<8x16xf32>
      %38 = vector.broadcast %27 : vector<8x1xf32> to vector<8x16xf32>
      %39 = arith.mulf %37, %38 : vector<8x16xf32>
      %cst_22 = arith.constant dense<0.000000e+00> : vector<8x16xf32>
      %40 = tpu.matmul %30, %20, %cst_22 {dimension_numbers = #tpu.dot_dimension_numbers<[1], [1], [0], [0], [0, 0, 1, 0], [], []>} : vector<8x210xf32>, vector<16x210xf32>, vector<8x16xf32> -> vector<8x16xf32>
      %41 = arith.addf %39, %40 : vector<8x16xf32>
      %c0_23 = arith.constant 0 : index
      %c0_24 = arith.constant 0 : index
      %42 = vector.load %arg10[%c0_23, %c0_24] : memref<8x16xf32, #tpu.memory_space<vmem>>, vector<8x16xf32>
      tpu.vector_store %arg10[%c0_23, %c0_24], %41 {strides = array<i32>} : memref<8x16xf32, #tpu.memory_space<vmem>>, vector<8x16xf32>,
      %c0_25 = arith.constant 0 : index
      %c0_26 = arith.constant 0 : index
      %43 = vector.load %arg8[%c0_25, %c0_26] : memref<8x1xf32, #tpu.memory_space<vmem>>, vector<8x1xf32>
      tpu.vector_store %arg8[%c0_25, %c0_26], %25 {strides = array<i32>} : memref<8x1xf32, #tpu.memory_space<vmem>>, vector<8x1xf32>,
    } else {
    }
    %c1_i32 = arith.constant 1 : i32
    %8 = arith.cmpi eq, %arg1, %c1_i32 : i32
    %c0_i32_4 = arith.constant 0 : i32
    %9 = arith.cmpi eq, %arg2, %c0_i32_4 : i32
    %10 = arith.andi %8, %9 : i1
    %11 = arith.extui %10 : i1 to i32
    %c0_i32_5 = arith.constant 0 : i32
    %12 = arith.cmpi ne, %11, %c0_i32_5 : i32
    scf.if %12 {
      %c0 = arith.constant 0 : index
      %c0_8 = arith.constant 0 : index
      %16 = vector.load %arg10[%c0, %c0_8] : memref<8x16xf32, #tpu.memory_space<vmem>>, vector<8x16xf32>
      %c0_9 = arith.constant 0 : index
      %c0_10 = arith.constant 0 : index
      %17 = vector.load %arg9[%c0_9, %c0_10] : memref<8x1xf32, #tpu.memory_space<vmem>>, vector<8x1xf32>
      %cst = arith.constant 1.000000e+00 : f32
      %18 = vector.broadcast %cst : f32 to vector<8x1xf32>
      %19 = arith.divf %18, %17 : vector<8x1xf32>
      %20 = vector.broadcast %19 : vector<8x1xf32> to vector<8x16xf32>
      %21 = arith.mulf %16, %20 : vector<8x16xf32>
      %22 = tpu.transpose %21, [1, 0] : vector<8x16xf32> -> vector<16x8xf32>
      %c0_11 = arith.constant 0 : index
      %c0_12 = arith.constant 0 : index
      %23 = vector.load %arg5[%c0_11, %c0_12] : memref<16x1xf32, #tpu.memory_space<vmem>>, vector<16x1xf32>
      %24 = vector.broadcast %23 : vector<16x1xf32> to vector<16x8xf32>
      %25 = arith.addf %22, %24 : vector<16x8xf32>
      %c0_13 = arith.constant 0 : index
      %c0_14 = arith.constant 0 : index
      %26 = vector.load %arg11[%c0_13, %c0_14] : memref<16x8xf32, #tpu.memory_space<vmem>>, vector<16x8xf32>
      tpu.vector_store %arg11[%c0_13, %c0_14], %25 {strides = array<i32>} : memref<16x8xf32, #tpu.memory_space<vmem>>, vector<16x8xf32>,
    } else {
    }
    %c1_i32_6 = arith.constant 1 : i32
    %13 = arith.cmpi eq, %arg1, %c1_i32_6 : i32
    %14 = arith.extui %13 : i1 to i32
    %c0_i32_7 = arith.constant 0 : i32
    %15 = arith.cmpi ne, %14, %c0_i32_7 : i32
    scf.if %15 {
      %c0 = arith.constant 0 : index
      %c0_8 = arith.constant 0 : index
      %c0_9 = arith.constant 0 : index
      %16 = vector.load %arg3[%c0, %c0_8, %c0_9] : memref<1x8x210xf32, #tpu.memory_space<vmem>>, vector<1x8x210xf32>
      %17 = vector.shape_cast %16 : vector<1x8x210xf32> to vector<8x210xf32>
      %c24 = arith.constant 24 : index
      %c0_10 = arith.constant 0 : index
      %18 = vector.load %arg4[%c24, %c0_10] : memref<32x8xf32, #tpu.memory_space<vmem>>, vector<8x8xf32>
      %cst = arith.constant dense<0.000000e+00> : vector<8x210xf32>
      %19 = tpu.matmul %18, %17, %cst {dimension_numbers = #tpu.dot_dimension_numbers<[1], [0], [0], [1], [0, 0, 1, 1], [], []>} : vector<8x8xf32>, vector<8x210xf32>, vector<8x210xf32> -> vector<8x210xf32>
      %c0_11 = arith.constant 0 : index
      %c0_12 = arith.constant 0 : index
      %20 = vector.load %arg6[%c0_11, %c0_12] : memref<8x1xf32, #tpu.memory_space<vmem>>, vector<8x1xf32>
      %21 = vector.broadcast %20 : vector<8x1xf32> to vector<8x210xf32>
      %22 = arith.addf %19, %21 : vector<8x210xf32>
      %cst_13 = arith.constant dense<0xFF800000> : vector<210xf32>
      %23 = vector.multi_reduction <maximumf>, %22, %cst_13 [0] : vector<8x210xf32> to vector<210xf32>
      %24 = vector.shape_cast %23 : vector<210xf32> to vector<1x210xf32>
      %25 = vector.broadcast %24 : vector<1x210xf32> to vector<8x210xf32>
      %26 = arith.subf %22, %25 : vector<8x210xf32>
      %27 = math.exp %26 : vector<8x210xf32>
      %cst_14 = arith.constant dense<0.000000e+00> : vector<210xf32>
      %28 = vector.multi_reduction <add>, %27, %cst_14 [0] : vector<8x210xf32> to vector<210xf32>
      %29 = vector.shape_cast %28 : vector<210xf32> to vector<1x210xf32>
      %30 = tpu.reciprocal %29 {approx = true} : vector<1x210xf32> -> vector<1x210xf32>
      %31 = arith.mulf %29, %30 : vector<1x210xf32>
      %cst_15 = arith.constant 2.000000e+00 : f32
      %32 = vector.broadcast %cst_15 : f32 to vector<1x210xf32>
      %33 = arith.subf %32, %31 : vector<1x210xf32>
      %34 = arith.mulf %30, %33 : vector<1x210xf32>
      %35 = arith.mulf %29, %34 : vector<1x210xf32>
      %cst_16 = arith.constant 2.000000e+00 : f32
      %36 = vector.broadcast %cst_16 : f32 to vector<1x210xf32>
      %37 = arith.subf %36, %35 : vector<1x210xf32>
      %38 = arith.mulf %34, %37 : vector<1x210xf32>
      %39 = vector.broadcast %38 : vector<1x210xf32> to vector<8x210xf32>
      %40 = arith.mulf %27, %39 : vector<8x210xf32>
      %c0_17 = arith.constant 0 : index
      %c0_18 = arith.constant 0 : index
      %41 = vector.load %arg11[%c0_17, %c0_18] : memref<16x8xf32, #tpu.memory_space<vmem>>, vector<16x8xf32>
      %cst_19 = arith.constant dense<0.000000e+00> : vector<16x210xf32>
      %42 = tpu.matmul %41, %40, %cst_19 {dimension_numbers = #tpu.dot_dimension_numbers<[1], [0], [0], [1], [0, 0, 1, 1], [], []>} : vector<16x8xf32>, vector<8x210xf32>, vector<16x210xf32> -> vector<16x210xf32>
      %c0_20 = arith.constant 0 : index
      %c0_21 = arith.constant 0 : index
      %c0_22 = arith.constant 0 : index
      %43 = vector.load %arg7[%c0_20, %c0_21, %c0_22] : memref<1x16x210xf32, #tpu.memory_space<vmem>>, vector<1x16x210xf32>
      %44 = vector.shape_cast %43 : vector<1x16x210xf32> to vector<16x210xf32>
      %45 = vector.shape_cast %42 : vector<16x210xf32> to vector<1x16x210xf32>
      tpu.vector_store %arg7[%c0_20, %c0_21, %c0_22], %45 {strides = array<i32>} : memref<1x16x210xf32, #tpu.memory_space<vmem>>, vector<1x16x210xf32>,
    } else {
    }
    return
  }
  func.func @transform_0(%arg0: i32, %arg1: i32, %arg2: i32) -> (i32, i32, i32) {
    %c0_i32 = arith.constant 0 : i32
    %c0_i32_0 = arith.constant 0 : i32
    return %arg0, %c0_i32, %arg2 : i32, i32, i32
  }
  func.func @transform_1(%arg0: i32, %arg1: i32, %arg2: i32) -> (i32, i32) {
    %c0_i32 = arith.constant 0 : i32
    %c0_i32_0 = arith.constant 0 : i32
    %c0_i32_1 = arith.constant 0 : i32
    return %c0_i32, %c0_i32_0 : i32, i32
  }
  func.func @transform_2(%arg0: i32, %arg1: i32, %arg2: i32) -> (i32, i32) {
    %c0_i32 = arith.constant 0 : i32
    %c0_i32_0 = arith.constant 0 : i32
    %c0_i32_1 = arith.constant 0 : i32
    return %c0_i32, %c0_i32_0 : i32, i32
  }
  func.func @transform_3(%arg0: i32, %arg1: i32, %arg2: i32) -> (i32, i32) {
    %c0_i32 = arith.constant 0 : i32
    %c0_i32_0 = arith.constant 0 : i32
    %c0_i32_1 = arith.constant 0 : i32
    return %c0_i32, %c0_i32_0 : i32, i32
  }
  func.func @transform_4(%arg0: i32, %arg1: i32, %arg2: i32) -> (i32, i32, i32) {
    %0 = arith.muli %arg2, %arg1 : i32
    %c0_i32 = arith.constant 0 : i32
    %c0_i32_0 = arith.constant 0 : i32
    return %arg0, %c0_i32, %0 : i32, i32, i32
  }
}

</mosaic_0001>

<bundles_post_ra>
// kernel: double_attention_forward.1
= control target key start
LH: loop header
LB: loop body
LE: loop exit
PB: predicated region body
PF: predicated region fallthrough
CT: control target
= control target key end

     0   :  { %s927_s15 = smov 0   ;;  %s929_s16 = smov 0   ;;  %s1034_s0 = inlined_call_operand.vmem [shape: f32[2,8,210], index: 0, kind: input, shape index: {}]   ;;  %s1035_s1 = inlined_call_operand.vmem [shape: f32[32,8], index: 1, kind: input, shape index: {}]   ;;  %s1036_s2 = inlined_call_operand.vmem [shape: f32[16,1], index: 2, kind: input, shape index: {}]   ;;  %s1037_s3 = inlined_call_operand.vmem [shape: f32[8,1], index: 3, kind: input, shape index: {}]   ;;  %s1038_s4 = inlined_call_operand.vmem [shape: f32[2,16,210], index: 4, kind: output, shape index: {}]  }
   0x1   :  { %s931_s17 = smov 0   ;;  %s933_s18 = smov 0  }
   0x2   :  { %s935_s19 = smov 0  }
   0x3 LB: > { %s29_s20 = sadd.s32 1, %s887_s17  ;;  %s33_s21 = sadd.s32 1, %s891_s18  ;;  %s895_s19 = sphi %s935_s19, %s14_s19   ;;  %s891_s18 = sphi %s933_s18, %s1042_s18   ;;  %s887_s17 = sphi %s931_s17, %s1041_s17   ;;  %s883_s16 = sphi %s929_s16, %s1040_s16   ;;  %s879_s15 = sphi %s927_s15, %s1039_s15  }
   0x4   : > { %p31_p0 = scmp.ge.s32.totalorder %s29_s20, 2  ;;  %p760_p1 = scmp.ge.s32.totalorder %s895_s19, 1 }
   0x5   : > { %p192_p2 = scmp.lt.s32.totalorder %s895_s19, 5 }
   0x6   : > { %s1044_s20 = smov (%p31_p0, %s29_s20), 0  ;;  %s1046_s21 = smov (!%p31_p0, %s33_s21), %s891_s18 }
   0x7   : > { %p193_p3 = pnand %p760_p1, %p192_p2  ;;  %p35_p4 = scmp.ge.s32.totalorder %s1046_s21, 2 }
   0x8   : > { %p228_p5 = scmp.lt.s32.totalorder (!%p193_p3), %s883_s16, 1  ;;  %p249_p6 = scmp.eq.s32.totalorder (!%p193_p3), %s879_s15, 0 }
   0x9   : > { %s1048_s21 = smov (%p35_p4, %s1046_s21), 0  ;;  %196 = sbr.rel (%p193_p3) target bundleno = 1204 (0x4b4), region = 36 }
   0xe   : > { %s1050_s16 = smov (!%p228_p5, %s883_s16), 1  ;;  %254 = sbr.rel (!%p249_p6) target bundleno = 19 (0x13), region = 40  ;;  %vm255_vm0 = vcmask (%p249_p6), 7168   ;;  %vm258_vm1 = vcmask (%p249_p6), 130048   ;;  %v897_v0 = vmov (%p249_p6), -inf   ;;  %v898_v1 = vmov (%p249_p6), 0.0  }
   0xf   : > { %s786_s22 = sshll.u32 %s1050_s16, 4  ;;  %s787_s23 = sshll.u32 %s1050_s16, 5  ;;  %256 = vst.msk [vmem:[#allocation2] sm:$0xff] (%p249_p6), %vm255_vm0, %v897_v0 }
  0x10   : > { %s963_s26 = scalar_lea.vmem %s1034_s0, %s786_s22  ;;  %s968_s29 = scalar_lea.vmem %s1038_s4, %s787_s23  ;;  %257 = vst.msk [vmem:[#allocation3] sm:$0xff] (%p249_p6), %vm255_vm0, %v898_v1 }
  0x11   : > { %259 = vst.msk [vmem:[#allocation4] sm:$0xff] (%p249_p6), %vm258_vm1, %v898_v1 }
  0x13 PF: > { %p766_p7 = scmp.ne.s32.totalorder %s879_s15, 0 }
  0x15   : > { %262 = sbr.rel (%p766_p7) target bundleno = 555 (0x22b), region = 44 }
  0x1a   : > { %v263_v2 = vld [vmem:[%s963_s26] sm:$0xff]  ;;  %v264_v3 = vld [vmem:[%s963_s26 + $0x8] sm:$0xff]  ;;  %vm268_vm2 = vcmask 64512   ;;  %v267_v6 = vld [vmem:[%s1035_s1 + $0x10] sm:$0xff]  ;;  %vm331_vm3 = vcmask 670720   ;;  %v899_v15 = vmov 0  }
  0x1b   : > { %v265_v4 = vld [vmem:[%s1035_s1] sm:$0xff]  ;;  %293 = vmatpush.msra.mxu0 %v263_v2  ;;  %319 = vmatpush.msra.mxu1 %v264_v3  ;;  %v266_v5 = vld [vmem:[%s1035_s1 + $0x8] sm:$0xff]  ;;  %vm358_vm4 = vcmask 7168   ;;  %v360_v36 = vld [vmem:[#allocation4] sm:$0xff]  ;;  %vm417_vm5 = vcmask 130048  }
  0x1c   : > { %767 = vmatmul.msk.f32.vlgmr.msra.gmra.mxu0 %vm268_vm2, %v265_v4  ;;  %770 = vmatmul.msk.f32.vlgmr.msra.gmra.mxu1 %vm268_vm2, %v265_v4  ;;  %v330_v16 = vld [vmem:[#allocation2] sm:$0xff]  ;;  %v351_v32 = vld [vmem:[#allocation3] sm:$0xff] }
  0x1d   : > { %836 = vset.pattern.permute.xlu0 %v899_v15  ;;  %837 = vset.pattern.permute.xlu1 %v899_v15 }
  0x24   : > { %768 = vmatmul.msk.f32.gmra.mxu0 %vm268_vm2, %v266_v5  ;;  %771 = vmatmul.msk.f32.gmra.mxu1 %vm268_vm2, %v266_v5 }
  0x2c   : > { %772 = vmatmul.msk.f32.gmra.mxu1 %vm268_vm2, %v267_v6  ;;  %769 = vmatmul.msk.f32.gmra.mxu0 %vm268_vm2, %v267_v6 }
  0x99   : > { %v295_v7 = vpop.f32.mrf.mxu0  ;;  %v321_v8 = vpop.f32.mrf.mxu1 }
  0xa1   : > { %v298_v9 = vpop.f32.mrf.mxu0  ;;  %v324_v10 = vpop.f32.mrf.mxu1 }
  0xa2   : > { %390 = vmatpush.xpose.msra.mxu2 %v298_v9  ;;  %773 = vmatpush.xpose.msk.msra.mxu3 %vm331_vm3, %v324_v10 }
  0xa6   : > { %391 = vmatpush.xpose.msra.mxu2 %v295_v7  ;;  %774 = vmatpush.xpose.msk.msra.mxu3 %vm331_vm3, %v321_v8 }
  0xa9   : > { %v327_v11 = vpop.f32.mrf.mxu1  ;;  %v301_v12 = vpop.f32.mrf.mxu0 }
  0xaa   : > { %v332_v13 = vsel %vm331_vm3, %v327_v11, -inf }
  0xab   : > { %v333_v14 = vmax.f32 %v301_v12, %v332_v13 }
  0xad   : > { %334 = vmax.xlane.f32.xlu0 %v333_v14 }
 0x120   : > { %v335_v17 = vpop.xlane.xlu0 %334 }
 0x121   : > { %v336_v18 = vmax.f32 %v330_v16, %v335_v17 }
 0x123   : > { %v337_v19 = vsub.f32 %v330_v16, %v336_v18  ;;  %419 = vst.msk [vmem:[#allocation2] sm:$0xff] %vm358_vm4, %v336_v18  ;;  %342 = vperm.xlu0 %836, %v336_v18  }
 0x125   : > { %v338_v20 = vmul.f32 1.442695, %v337_v19 }
 0x127   : > { %838 = vpow2.f32 %v338_v20 }
 0x12d   : > { %v839_v21 = vpop.eup %838 }
 0x12e   : > { %363 = vperm.xlu1 %837, %v839_v21   ;;  %v352_v33 = vmul.f32 %v839_v21, %v351_v32 }
 0x195   : > { %v343_v22 = vpop.permute.xlu0 %342 }
 0x196   : > { %v345_v23 = vsub.f32 %v301_v12, %v343_v22  ;;  %v346_v24 = vsub.f32 %v327_v11, %v343_v22 }
 0x198   : > { %v347_v25 = vmul.f32 1.442695, %v345_v23  ;;  %v349_v26 = vmul.f32 1.442695, %v346_v24 }
 0x19a   : > { %840 = vpow2.f32 %v347_v25 }
 0x19b   : > { %842 = vpow2.f32 %v349_v26 }
 0x1a0   : > { %v841_v27 = vpop.eup %840  ;;  %v364_v31 = vpop.permute.xlu1 %363 }
 0x1a1   : > { %v843_v28 = vpop.eup %842  ;;  %392 = vmatmul.f32.vlgmr.msra.gmra.mxu2 %v841_v27  ;;  %v366_v39 = vmul.f32 %v364_v31, %v360_v36 }
 0x1a2   : > { %775 = vmatmul.msk.f32.vlgmr.msra.gmra.mxu3 %vm331_vm3, %v843_v28  ;;  %v353_v29 = vsel %vm331_vm3, %v843_v28, 0.0 }
 0x1a3   : > { %v354_v30 = vadd.f32 %v841_v27, %v353_v29 }
 0x1a5   : > { %355 = vadd.xlane.f32.xlu1 %v354_v30 }
 0x218   : > { %v356_v34 = vpop.xlane.xlu1 %355 }
 0x219   : > { %v357_v35 = vadd.f32 %v356_v34, %v352_v33 }
 0x21b   : > { %359 = vst.msk [vmem:[#allocation3] sm:$0xff] %vm358_vm4, %v357_v35 }
 0x224   : > { %v393_v37 = vpop.f32.mrf.mxu2 }
 0x225   : > { %v413_v38 = vpop.f32.mrf.mxu3 }
 0x226   : > { %v414_v40 = vadd.f32 %v413_v38, %v393_v37 }
 0x228   : > { %v416_v41 = vadd.f32 %v414_v40, %v366_v39 }
 0x22a   : > { %418 = vst.msk [vmem:[#allocation4] sm:$0xff] %vm417_vm5, %v416_v41 }
 0x22b PF: > { %p420_p8 = scmp.eq.s32.totalorder %s879_s15, 1 }
 0x22c   : > { %v426_v42 = vld [vmem:[#allocation3] sm:$0xff] (%p420_p8)  ;;  %v900_v43 = vmov (%p420_p8), 0   ;;  %v480_v54 = vld [vmem:[%s1036_s2] sm:$0xff] (%p420_p8)  ;;  %vm494_vm10 = vcmask (%p420_p8), 64512  }
 0x22d   : > { %424 = sbr.rel (!%p420_p8) target bundleno = 867 (0x363), region = 48  ;;  %844 = vset.pattern.permute.xlu0 (%p420_p8), %v900_v43  ;;  %846 = vrcp.f32 (%p420_p8), %v426_v42  ;;  %845 = vset.pattern.permute.xlu1 (%p420_p8), %v900_v43  ;;  %v438_v46 = vand.u32 (%p420_p8), 2147483648, %v426_v42  ;;  %vm432_vm6 = vweird.f32 (%p420_p8), %v426_v42  ;;  %v436_v48 = vand.u32 (%p420_p8), 2147483647, %v426_v42  ;;  %v481_v55 = vld [vmem:[%s1036_s2 + $0x8] sm:$0xff] (%p420_p8) }
 0x22e   : > { %484 = vperm.xlu1 (%p420_p8), %845, %v480_v54  }
 0x22f   : > { %v439_v50 = vor.u32 (%p420_p8), 1.1754944e-38, %v438_v46  ;;  %vm437_vm9 = vcmp.eq.f32.partialorder (%p420_p8), %v436_v48, 8.507059e+37 }
 0x231   : > { %v425_v56 = vld [vmem:[#allocation4] sm:$0xff] (%p420_p8) }
 0x233   : > { %v847_v44 = vpop.eup %846 }
 0x234   : > { %v428_v45 = vmul.f32 %v847_v44, %v426_v42  ;;  %vm433_vm7 = vweird.f32 %v847_v44 }
 0x235   : > { %vm434_vm8 = vmor %vm432_vm6, %vm433_vm7 }
 0x236   : > { %v429_v47 = vsub.f32 1.0, %v428_v45  ;;  %489 = vperm.xlu1 %845, %v481_v55  }
 0x238   : > { %v430_v49 = vmul.f32 %v847_v44, %v429_v47 }
 0x23a   : > { %v431_v51 = vadd.f32 %v847_v44, %v430_v49 }
 0x23c   : > { %v435_v52 = vsel %vm434_vm8, %v847_v44, %v431_v51 }
 0x23d   : > { %v440_v53 = vsel %vm437_vm9, %v439_v50, %v435_v52 }
 0x23e   : > { %444 = vperm.xlu0 %844, %v440_v53  }
 0x2a0   : > { %v485_v59 = vpop.permute.xlu1 %484 }
 0x2a8   : > { %v490_v62 = vpop.permute.xlu1 %489 }
 0x2b0   : > { %v445_v57 = vpop.permute.xlu0 %444 }
 0x2b1   : > { %v447_v58 = vmul.f32 %v445_v57, %v425_v56 }
 0x2b3   : > { %448 = vxpose.xlu0.b32.start.end [1/1] (short) (narrow) %v447_v58, 16 }
 0x357   : > { %v464_v60 = vpop.trf.xlu0 }
 0x358   : > { %v492_v61 = vadd.f32 %v485_v59, %v464_v60 }
 0x35a   : > { %495 = vst.msk [vmem:[#allocation5] sm:$0xff] %vm494_vm10, %v492_v61 }
 0x35f   : > { %v465_v63 = vpop.trf.xlu0 }
 0x360   : > { %v493_v0 = vadd.f32 %v490_v62, %v465_v63 }
 0x362   : > { %496 = vst.msk [vmem:[#allocation5 + $0x8] sm:$0xff] %vm494_vm10, %v493_v0 }
 0x363 PF: > { %p777_p9 = scmp.ne.s32.totalorder %s879_s15, 1 }
 0x365   : > { %499 = sbr.rel (%p777_p9) target bundleno = 1204 (0x4b4), region = 52 }
 0x36a   : > { %v500_v1 = vld [vmem:[%s963_s26] sm:$0xff]  ;;  %v501_v2 = vld [vmem:[%s963_s26 + $0x8] sm:$0xff]  ;;  %v502_v3 = vld [vmem:[%s1035_s1 + $0x18] sm:$0xff]  ;;  %vm509_vm11 = vcmask 64512   ;;  %v901_v5 = vmov 0   ;;  %vm559_vm12 = vcmask 670720  }
 0x36b   : > { %528 = vmatpush.msra.mxu0 %v500_v1  ;;  %548 = vmatpush.msra.mxu1 %v501_v2  ;;  %v503_v4 = vld [vmem:[%s1037_s3] sm:$0xff]  ;;  %v602_v58 = vld [vmem:[#allocation5] sm:$0xff] }
 0x36c   : > { %778 = vmatmul.msk.f32.vlgmr.msra.gmra.mxu0 %vm509_vm11, %v502_v3  ;;  %779 = vmatmul.msk.f32.vlgmr.msra.gmra.mxu1 %vm509_vm11, %v502_v3  ;;  %v603_v60 = vld [vmem:[#allocation5 + $0x8] sm:$0xff] }
 0x36d   : > { %848 = vset.pattern.permute.xlu0 %v901_v5 }
 0x36e   : > { %506 = vperm.xlu0 %848, %v503_v4  }
 0x3e0   : > { %v507_v6 = vpop.permute.xlu0 %506 }
 0x3e9   : > { %v530_v7 = vpop.f32.mrf.mxu0  ;;  %v550_v8 = vpop.f32.mrf.mxu1 }
 0x3ea   : > { %v531_v9 = vadd.f32 %v530_v7, %v507_v6  ;;  %v551_v10 = vadd.f32 %v550_v8, %v507_v6 }
 0x3ec   : > { %v553_v11 = vrot.slane %v531_v9, 4  ;;  %v560_v12 = vsel %vm559_vm12, %v551_v10, -inf }
 0x3ed   : > { %v561_v13 = vrot.slane %v560_v12, 4 }
 0x3ee   : > { %v554_v14 = vmax.f32 %v531_v9, %v553_v11 }
 0x3ef   : > { %v562_v15 = vmax.f32 %v560_v12, %v561_v13 }
 0x3f0   : > { %v555_v16 = vrot.slane %v554_v14, 2 }
 0x3f1   : > { %v563_v17 = vrot.slane %v562_v15, 2 }
 0x3f2   : > { %v556_v18 = vmax.f32 %v554_v14, %v555_v16 }
 0x3f3   : > { %v564_v19 = vmax.f32 %v562_v15, %v563_v17 }
 0x3f4   : > { %v557_v20 = vrot.slane %v556_v18, 1 }
 0x3f5   : > { %v565_v21 = vrot.slane %v564_v19, 1 }
 0x3f6   : > { %v558_v22 = vmax.f32 %v556_v18, %v557_v20 }
 0x3f7   : > { %v566_v23 = vmax.f32 %v564_v19, %v565_v21 }
 0x3f8   : > { %v567_v24 = vsub.f32 %v531_v9, %v558_v22 }
 0x3f9   : > { %v568_v25 = vsub.f32 %v551_v10, %v566_v23 }
 0x3fa   : > { %v569_v26 = vmul.f32 1.442695, %v567_v24 }
 0x3fb   : > { %v571_v27 = vmul.f32 1.442695, %v568_v25 }
 0x3fc   : > { %849 = vpow2.f32 %v569_v26 }
 0x3fd   : > { %851 = vpow2.f32 %v571_v27 }
 0x402   : > { %v850_v28 = vpop.eup %849 }
 0x403   : > { %v852_v29 = vpop.eup %851  ;;  %v573_v30 = vrot.slane %v850_v28, 4 }
 0x404   : > { %v579_v31 = vsel %vm559_vm12, %v852_v29, 0.0 }
 0x405   : > { %v580_v32 = vrot.slane %v579_v31, 4  ;;  %v574_v33 = vadd.f32 %v850_v28, %v573_v30 }
 0x407   : > { %v581_v34 = vadd.f32 %v580_v32, %v579_v31  ;;  %v575_v35 = vrot.slane %v574_v33, 2 }
 0x409   : > { %v576_v36 = vadd.f32 %v575_v35, %v574_v33  ;;  %v582_v37 = vrot.slane %v581_v34, 2 }
 0x40b   : > { %v577_v38 = vrot.slane %v576_v36, 1  ;;  %v583_v39 = vadd.f32 %v582_v37, %v581_v34 }
 0x40d   : > { %v578_v40 = vadd.f32 %v577_v38, %v576_v36  ;;  %v584_v41 = vrot.slane %v583_v39, 1 }
 0x40f   : > { %853 = vrcp.f32 %v578_v40  ;;  %v585_v42 = vadd.f32 %v584_v41, %v583_v39 }
 0x411   : > { %855 = vrcp.f32 %v585_v42 }
 0x415   : > { %v854_v43 = vpop.eup %853 }
 0x416   : > { %v588_v44 = vmul.f32 %v854_v43, %v578_v40 }
 0x417   : > { %v856_v45 = vpop.eup %855 }
 0x418   : > { %v590_v46 = vsub.f32 2.0, %v588_v44  ;;  %v589_v47 = vmul.f32 %v856_v45, %v585_v42 }
 0x41a   : > { %v592_v48 = vmul.f32 %v854_v43, %v590_v46  ;;  %v591_v49 = vsub.f32 2.0, %v589_v47 }
 0x41c   : > { %v594_v50 = vmul.f32 %v592_v48, %v578_v40  ;;  %v593_v51 = vmul.f32 %v856_v45, %v591_v49 }
 0x41e   : > { %v596_v52 = vsub.f32 2.0, %v594_v50  ;;  %v595_v53 = vmul.f32 %v593_v51, %v585_v42 }
 0x420   : > { %v598_v54 = vmul.f32 %v596_v52, %v592_v48  ;;  %v597_v55 = vsub.f32 2.0, %v595_v53 }
 0x422   : > { %v600_v56 = vmul.f32 %v850_v28, %v598_v54  ;;  %v599_v57 = vmul.f32 %v597_v55, %v593_v51 }
 0x424   : > { %625 = vmatpush.msra.mxu2 %v600_v56  ;;  %v601_v59 = vmul.f32 %v852_v29, %v599_v57 }
 0x425   : > { %780 = vmatmul.msk.f32.vlgmr.msra.gmra.mxu2 %vm509_vm11, %v602_v58 }
 0x426   : > { %648 = vmatpush.msra.mxu3 %v601_v59 }
 0x427   : > { %782 = vmatmul.msk.f32.vlgmr.msra.gmra.mxu3 %vm509_vm11, %v602_v58 }
 0x42d   : > { %781 = vmatmul.msk.f32.gmra.mxu2 %vm509_vm11, %v603_v60 }
 0x42f   : > { %783 = vmatmul.msk.f32.gmra.mxu3 %vm509_vm11, %v603_v60 }
 0x4a8   : > { %v627_v61 = vpop.f32.mrf.mxu2 }
 0x4a9   : > { %656 = vst [vmem:[%s968_s29] sm:$0xff] %v627_v61 }
 0x4aa   : > { %v650_v62 = vpop.f32.mrf.mxu3 }
 0x4ab   : > { %657 = vst.msk [vmem:[%s968_s29 + $0x8] sm:$0xff] %vm559_vm12, %v650_v62 }
 0x4b0   : > { %v630_v63 = vpop.f32.mrf.mxu2 }
 0x4b1   : > { %658 = vst [vmem:[%s968_s29 + $0x10] sm:$0xff] %v630_v63 }
 0x4b2   : > { %v653_v0 = vpop.f32.mrf.mxu3 }
 0x4b3   : > { %659 = vst.msk [vmem:[%s968_s29 + $0x18] sm:$0xff] %vm559_vm12, %v653_v0 }
 0x4b4 PF: > { %s14_s19 = sadd.s32 1, %s895_s19   ;;  %s1039_s15 = smov %s887_s17 }
 0x4b5   : > { %p11_p10 = scmp.ge.s32.totalorder %s14_s19, 6   ;;  %s1040_s16 = smov %s891_s18 }
 0x4b6   : > { %s1041_s17 = smov %s1044_s20  ;;  %s1042_s18 = smov %s1048_s21 }
 0x4b7   :  { %13 = sbr.rel (!%p11_p10) target bundleno = 3 (0x3), region = 82 }

</bundles_post_ra>
